<compile_context>
chip_gen: v5e
topology: v5e:2x2
jax: 0.10.0
libtpu: 0.0.40
codegen_flags: <defaults>
</compile_context>

<pallas_src>
import math

import jax
import jax.numpy as jnp
from jax.experimental import pallas as pl
from jax.experimental.pallas import tpu as pltpu


_TARGET_BLOCK_BYTES = 4 * 1024 * 1024    # ~4 MiB per block, per buffer
_MIN_PIPELINED_BYTES = 256 * 1024        # below this a single block is fine
_VMEM_LIMIT_BYTES = 32 * 1024 * 1024     # 2 bufs x (in + out) x 4 MiB = 16 MiB


def _gaussian_loss_kernel(params_ref, x_ref, o_ref):
    """Elementwise: loss = 1 - norm * exp(c * (x - mu)^2).

    params_ref (SMEM, f32[3]) holds [mu, c, norm] as runtime scalars.
    """
    mu = params_ref[0]
    c = params_ref[1]
    norm = params_ref[2]
    x = x_ref[...].astype(jnp.float32)
    d = x - mu
    o_ref[...] = (1.0 - norm * jnp.exp(c * (d * d))).astype(o_ref.dtype)


def _round_up(x: int, m: int) -> int:
    return ((x + m - 1) // m) * m


def _choose_lane(total: int):
    for lane in (1024, 512, 256, 128):
        if total % lane == 0:
            return lane
    return None  # ragged: handled by the pad-free 1D path


def gaussian_loss(y_pred: jax.Array, threshold, sigma=1.0) -> jax.Array:
    """Elementwise Gaussian loss, computed in a Pallas TPU kernel."""
    orig_shape = y_pred.shape
    in_dtype = y_pred.dtype
    out_dtype = in_dtype if jnp.issubdtype(in_dtype, jnp.floating) else jnp.float32
    total = int(y_pred.size)
    if total == 0:
        return jnp.zeros(orig_shape, out_dtype)

    # Runtime scalars (SMEM): mu, c = -0.5/sigma^2, norm = 1/(sigma*sqrt(2*pi)).
    # Passing them as data (not python constants) avoids a recompile per value.
    sigma32 = jnp.asarray(sigma, jnp.float32)
    params = jnp.stack([
        jnp.asarray(threshold, jnp.float32),
        -0.5 / (sigma32 * sigma32),
        1.0 / (sigma32 * jnp.float32(math.sqrt(2.0 * math.pi))),
    ])

    in_isz = jnp.dtype(in_dtype).itemsize
    out_isz = jnp.dtype(out_dtype).itemsize
    itemsize = max(in_isz, out_isz)
    total_bytes = total * itemsize

    cost = pl.CostEstimate(
        flops=5 * total,
        transcendentals=total,
        bytes_accessed=total * (in_isz + out_isz),
    )
    cparams = pltpu.CompilerParams(
        dimension_semantics=("parallel",),
        vmem_limit_bytes=_VMEM_LIMIT_BYTES,
    )
    smem_spec = pl.BlockSpec(memory_space=pltpu.MemorySpace.SMEM)

    flat = y_pred.reshape(-1)
    lane = _choose_lane(total)

    if lane is not None:
        # ---- Primary path: lane-dense 2D slab, byte-budget row tiles. ----
        rows = total // lane
        x2d = flat.reshape(rows, lane)

        if total_bytes < _MIN_PIPELINED_BYTES or rows <= 8:
            row_tile = rows  # single full-extent block (divisibility-exempt)
        else:
            budget_rows = max(8, (_TARGET_BLOCK_BYTES // (lane * itemsize)) // 8 * 8)
            quarter = max(8, _round_up(-(-rows // 4), 8))  # ensure >= 4 grid steps
            row_tile = min(budget_rows, quarter)
        grid = (pl.cdiv(rows, row_tile),)

        out2d = pl.pallas_call(
            _gaussian_loss_kernel,
            out_shape=jax.ShapeDtypeStruct((rows, lane), out_dtype),
            grid=grid,
            in_specs=[smem_spec,
                      pl.BlockSpec((row_tile, lane), lambda i: (i, 0))],
            out_specs=pl.BlockSpec((row_tile, lane), lambda i: (i, 0)),
            compiler_params=cparams,
            cost_estimate=cost,
        )(params, x2d)
        return out2d.reshape(orig_shape)

    # ---- Ragged fallback (size not a multiple of 128): pad-free 1D tiling. ----
    # The partial final block is masked by the grid, so no jnp.pad / slice pass.
    if total_bytes < _MIN_PIPELINED_BYTES:
        blk = total  # full-extent 1D block
    else:
        budget = max(1024, (_TARGET_BLOCK_BYTES // itemsize) // 1024 * 1024)
        quarter = max(1024, _round_up(-(-total // 4), 1024))
        blk = min(budget, quarter)
    grid = (pl.cdiv(total, blk),)

    out1d = pl.pallas_call(
        _gaussian_loss_kernel,
        out_shape=jax.ShapeDtypeStruct((total,), out_dtype),
        grid=grid,
        in_specs=[smem_spec, pl.BlockSpec((blk,), lambda i: (i,))],
        out_specs=pl.BlockSpec((blk,), lambda i: (i,)),
        compiler_params=cparams,
        cost_estimate=cost,
    )(params, flat)
    return out1d.reshape(orig_shape)


def gaussian_loss_ref(y_pred, threshold, sigma=1.0):
    """Pure-JAX reference matching the PyTorch forward."""
    mu = threshold
    pdf = jnp.exp(-0.5 * ((y_pred - mu) / sigma) ** 2) / (
        sigma * jnp.sqrt(2.0 * jnp.pi)
    )
    return 1.0 - pdf


if __name__ == "__main__":
    key = jax.random.PRNGKey(0)
    threshold = 0.5

    # NCHW prediction map, consistent with the module's intended use.
    x = jax.random.normal(key, (2, 4, 16, 16), dtype=jnp.float32)
    out = jax.block_until_ready(gaussian_loss(x, threshold))
    ref = gaussian_loss_ref(x, threshold)
    assert out.shape == x.shape and out.dtype == x.dtype
    assert jnp.allclose(out, ref, atol=1e-6, rtol=1e-6)

    # Slightly larger input to exercise the multi-step pipelined grid path.
    x2 = jax.random.normal(jax.random.PRNGKey(1), (4, 4, 64, 64), dtype=jnp.float32)
    out2 = jax.block_until_ready(gaussian_loss(x2, threshold))
    assert jnp.allclose(out2, gaussian_loss_ref(x2, threshold), atol=1e-6, rtol=1e-6)

    print("KERNEL_OK")
</pallas_src>

<mosaic_0001>
module attributes {stable_mosaic.version = 11 : i64} {
  func.func @_gaussian_loss_kernel(%arg0: i32, %arg1: memref<3xf32, #tpu.memory_space<smem>>, %arg2: memref<2x1024xf32, #tpu.memory_space<vmem>>, %arg3: memref<2x1024xf32, #tpu.memory_space<vmem>>) attributes {dimension_semantics = [#tpu.dimension_semantics<parallel>], iteration_bounds = array<i64: 1>, scalar_prefetch = 0 : i64, scratch_operands = 0 : i64, tpu.core_type = #tpu.core_type<tc>, window_params = [{transform_indices = @transform_0, window_bounds = array<i64: 3>}, {transform_indices = @transform_1, window_bounds = array<i64: 2, 1024>}, {transform_indices = @transform_2, window_bounds = array<i64: 2, 1024>}]} {
    %c0 = arith.constant 0 : index
    %0 = memref.load %arg1[%c0] : memref<3xf32, #tpu.memory_space<smem>>
    %c1 = arith.constant 1 : index
    %1 = memref.load %arg1[%c1] : memref<3xf32, #tpu.memory_space<smem>>
    %c2 = arith.constant 2 : index
    %2 = memref.load %arg1[%c2] : memref<3xf32, #tpu.memory_space<smem>>
    %c0_0 = arith.constant 0 : index
    %c0_1 = arith.constant 0 : index
    %3 = vector.load %arg2[%c0_0, %c0_1] : memref<2x1024xf32, #tpu.memory_space<vmem>>, vector<2x1024xf32>
    %4 = vector.broadcast %0 : f32 to vector<2x1024xf32>
    %5 = arith.subf %3, %4 : vector<2x1024xf32>
    %6 = arith.mulf %5, %5 : vector<2x1024xf32>
    %7 = vector.broadcast %1 : f32 to vector<2x1024xf32>
    %8 = arith.mulf %7, %6 : vector<2x1024xf32>
    %9 = math.exp %8 : vector<2x1024xf32>
    %10 = vector.broadcast %2 : f32 to vector<2x1024xf32>
    %11 = arith.mulf %10, %9 : vector<2x1024xf32>
    %cst = arith.constant 1.000000e+00 : f32
    %12 = vector.broadcast %cst : f32 to vector<2x1024xf32>
    %13 = arith.subf %12, %11 : vector<2x1024xf32>
    %c0_2 = arith.constant 0 : index
    %c0_3 = arith.constant 0 : index
    %14 = vector.load %arg3[%c0_2, %c0_3] : memref<2x1024xf32, #tpu.memory_space<vmem>>, vector<2x1024xf32>
    tpu.vector_store %arg3[%c0_2, %c0_3], %13 {strides = array<i32>} : memref<2x1024xf32, #tpu.memory_space<vmem>>, vector<2x1024xf32>,
    return
  }
  func.func @transform_0(%arg0: i32) -> i32 {
    %c0_i32 = arith.constant 0 : i32
    %c0_i32_0 = arith.constant 0 : i32
    return %c0_i32 : i32
  }
  func.func @transform_1(%arg0: i32) -> (i32, i32) {
    %c0_i32 = arith.constant 0 : i32
    %c0_i32_0 = arith.constant 0 : i32
    return %arg0, %c0_i32 : i32, i32
  }
  func.func @transform_2(%arg0: i32) -> (i32, i32) {
    %c0_i32 = arith.constant 0 : i32
    %c0_i32_0 = arith.constant 0 : i32
    return %arg0, %c0_i32 : i32, i32
  }
}

</mosaic_0001>

<bundles_post_ra>
// kernel: tpu_custom_call.1
= control target key start
LH: loop header
LB: loop body
LE: loop exit
PB: predicated region body
PF: predicated region fallthrough
CT: control target
= control target key end

     0   :  { %7 = vsyncpa [#allocation5], 0  ;;  %s183_s0 = inlined_call_operand.hbm [shape: f32[3], index: 0, kind: input, shape index: {}]   ;;  %s184_s1 = inlined_call_operand.hbm [shape: f32[2,1024], index: 1, kind: input, shape index: {}]   ;;  %s185_s2 = inlined_call_operand.hbm [shape: f32[2,1024], index: 2, kind: output, shape index: {}]  }
   0x1   :  { %8 = vsyncpa [#allocation3], 0 }
   0x2   :  { %9 = vsyncpa [#allocation4], 0  ;;  %s15_s11 = sshll.u32 %s183_s0, 4  ;;  %s24_s14 = sshll.u32 %s184_s1, 4  ;;  %s16_s11 = int_to_ptr.hbm [resolvable:$true] %s15_s11  ;;  %s25_s14 = int_to_ptr.hbm [resolvable:$true] %s24_s14 }
   0x3   :  { %s156_s15 = smov [#allocation2]   ;;  %s157_s16 = smov [#allocation6]  }
   0x4   :  { %18 = dma.hbm_to_smem %s16_s11, 16, %s156_s15, [#allocation5]  }
   0x5   :  { %s26_s17 = sshll.u32 %s157_s16, 4  ;;  %s27_s17 = int_to_ptr.vmem [resolvable:$true] %s26_s17 }
   0x6   :  { %29 = dma.hbm_to_vmem [thread:$0]  %s25_s14, 256, %s27_s17, [#allocation3]  }
   0x7   :  { %150 = dma.done.wait [#allocation5], 16  }
   0x8   :  { %151 = vsyncadd [#allocation5], 4294967280 }
   0x9   :  { %152 = dma.done.wait [#allocation3], 256  }
   0xa   :  { %153 = vsyncadd [#allocation3], 4294967040 }
   0xb   :  { %38 = sfence }
   0xc   :  { %s39_s18 = sld [smem:[#allocation2]]  ;;  %v42_v0 = vld [vmem:[#allocation6] sm:$0xff]  ;;  %v43_v1 = vld [vmem:[#allocation6 + $0x8] sm:$0xff]  ;;  %s158_s1 = smov [#allocation7]  }
   0xd   :  { %s81_s19 = sld [smem:[#allocation2 + $0x1]]  ;;  %s68_s20 = sshll.u32 %s158_s1, 4  ;;  %s69_s20 = int_to_ptr.vmem [resolvable:$true] %s68_s20 }
   0xe   :  { %s82_s0 = sld [smem:[#allocation2 + $0x2]]  ;;  %s70_s23 = sshll.u32 %s185_s2, 4  ;;  %s71_s23 = int_to_ptr.hbm [resolvable:$true] %s70_s23 }
  0x12   :  { %v44_v2 = vstv %s39_s18 }
  0x13   :  { %v45_v3 = vsub.f32 %v42_v0, %v44_v2  ;;  %v46_v4 = vsub.f32 %v43_v1, %v44_v2  ;;  %v49_v5 = vstv %s81_s19 }
  0x14   :  { %v56_v12 = vstv %s82_s0 }
  0x15   :  { %v47_v6 = vmul.f32 %v45_v3, %v45_v3  ;;  %v48_v7 = vmul.f32 %v46_v4, %v46_v4 }
  0x17   :  { %v50_v8 = vmul.f32 %v49_v5, %v47_v6  ;;  %v51_v9 = vmul.f32 %v49_v5, %v48_v7 }
  0x19   :  { %v52_v10 = vmul.f32 1.442695, %v50_v8  ;;  %v54_v11 = vmul.f32 1.442695, %v51_v9 }
  0x1b   :  { %86 = vpow2.f32 %v52_v10 }
  0x1c   :  { %88 = vpow2.f32 %v54_v11 }
  0x21   :  { %v87_v13 = vpop.eup %86 }
  0x22   :  { %v89_v14 = vpop.eup %88  ;;  %v57_v15 = vmul.f32 %v87_v13, %v56_v12 }
  0x23   :  { %v58_v16 = vmul.f32 %v89_v14, %v56_v12 }
  0x24   :  { %v59_v17 = vsub.f32 1.0, %v57_v15 }
  0x25   :  { %v60_v18 = vsub.f32 1.0, %v58_v16 }
  0x26   :  { %61 = vst [vmem:[#allocation7] sm:$0xff] %v59_v17 }
  0x27   :  { %62 = vst [vmem:[#allocation7 + $0x8] sm:$0xff] %v60_v18 }
  0x28   :  { %73 = dma.vmem_to_hbm [thread:$0]  %s69_s20, 256, %s71_s23, [#allocation4]  }
  0x29   :  { %154 = dma.done.wait [#allocation4], 256  }
  0x2a   :  { %155 = vsyncadd [#allocation4], 4294967040 }
  0x2b   :  { %78 = vsyncpa [#allocation3], 1 }
  0x2c   :  { %79 = vsyncpa [#allocation4], 1 }
  0x2d   :  { %80 = vsyncpa [#allocation5], 1 }

</bundles_post_ra>
